<compile_context>
chip_gen: v6e
topology: v6e:2x2x1
jax: 0.10.0
libtpu: 0.0.40
codegen_flags: <defaults>
</compile_context>

<pallas_src>
import functools

import jax
import jax.numpy as jnp
from jax import lax
from jax.experimental import pallas as pl
from jax.experimental.pallas import tpu as pltpu


def _soft_assign_t(X, x2t, C, inv_temp):
    """Soft assignments in transposed, lane-dense (K, n) layout.

    X    : (n, D)  sample tile
    x2t  : (1, n)  precomputed ||x||^2 row
    C    : (K, D)  centroids
    returns aT : (K, n), aT[k, j] = softmax_k(-||x_j - c_k|| / temp)
    """
    c2 = jnp.sum(C * C, axis=1, keepdims=True)                       # (K, 1)
    # C @ X.T without materializing any transpose (trans_b matmul on the MXU).
    xct = lax.dot_general(C, X, (((1,), (1,)), ((), ())),
                          preferred_element_type=jnp.float32)        # (K, n)
    d = -jnp.sqrt(jnp.maximum(c2 + x2t - 2.0 * xct, 0.0))            # (K, n)
    logits = d * inv_temp
    m = jnp.max(logits, axis=0, keepdims=True)                       # (1, n)
    e = jnp.exp(logits - m)                                          # (K, n)
    denom = jnp.sum(e, axis=0, keepdims=True)                        # (1, n)
    return e * pl.reciprocal(denom, approx=True)                     # (K, n)


def _dkm_update_kernel(x2t_ref, x_ref, c_ref, cnew_ref, diff_ref,
                       num_acc, asum_acc, *, temp, eps, n_valid, block_n):
    """Accumulate a.T @ X and sum_n(a) over N tiles; finalize C_new and diff."""
    i = pl.program_id(0)

    @pl.when(i == 0)
    def _init():
        num_acc[...] = jnp.zeros_like(num_acc)
        asum_acc[...] = jnp.zeros_like(asum_acc)

    X = x_ref[...]                                                   # (bn, D)
    C = c_ref[...]                                                   # (K, D)
    at = _soft_assign_t(X, x2t_ref[...], C, 1.0 / temp)              # (K, bn)

    if n_valid % block_n != 0:
        # Mask out the zero-padded samples in the last tile.
        col = i * block_n + lax.broadcasted_iota(jnp.int32, at.shape, 1)
        at = jnp.where(col < n_valid, at, 0.0)

    asum_acc[...] += jnp.sum(at, axis=1, keepdims=True)              # (K, 1)
    num_acc[...] += jnp.dot(at, X,
                            preferred_element_type=jnp.float32)      # (K, D)

    @pl.when(i == pl.num_programs(0) - 1)
    def _finalize():
        cnew = num_acc[...] * pl.reciprocal(asum_acc[...] + eps, approx=True)
        cnew_ref[...] = cnew
        absdiff = jnp.abs(cnew - C)
        diff_ref[...] = jnp.sum(jnp.sum(absdiff, axis=1, keepdims=True),
                                axis=0, keepdims=True)               # (1, 1)


def _dkm_assign_kernel(x2t_ref, x_ref, c_ref, at_ref, *, temp):
    """Final soft assignments, written once in lane-dense (K, block_n) tiles."""
    at_ref[...] = _soft_assign_t(x_ref[...], x2t_ref[...], c_ref[...],
                                 1.0 / temp)


def _make_kernels(n_pad, N, D, K, block_n, temp, eps):
    grid = (n_pad // block_n,)
    x2t_spec = pl.BlockSpec((1, block_n), lambda i: (0, i))
    x_spec = pl.BlockSpec((block_n, D), lambda i: (i, 0))
    c_spec = pl.BlockSpec((K, D), lambda i: (0, 0))

    update = pl.pallas_call(
        functools.partial(_dkm_update_kernel, temp=temp, eps=eps,
                          n_valid=N, block_n=block_n),
        out_shape=(jax.ShapeDtypeStruct((K, D), jnp.float32),   # C_new
                   jax.ShapeDtypeStruct((1, 1), jnp.float32)),  # diff (L1)
        grid=grid,
        in_specs=[x2t_spec, x_spec, c_spec],
        out_specs=(pl.BlockSpec((K, D), lambda i: (0, 0)),
                   pl.BlockSpec((1, 1), lambda i: (0, 0))),
        scratch_shapes=[pltpu.VMEM((K, D), jnp.float32),
                        pltpu.VMEM((K, 1), jnp.float32)],
        compiler_params=pltpu.CompilerParams(
            dimension_semantics=("arbitrary",)),
    )

    assign = pl.pallas_call(
        functools.partial(_dkm_assign_kernel, temp=temp),
        out_shape=jax.ShapeDtypeStruct((K, n_pad), jnp.float32),  # a^T
        grid=grid,
        in_specs=[x2t_spec, x_spec, c_spec],
        out_specs=pl.BlockSpec((K, block_n), lambda i: (0, i)),
        compiler_params=pltpu.CompilerParams(
            dimension_semantics=("parallel",)),
    )
    return update, assign


def dkm_forward(X, C_init, temp=0.5, threshold=1e-4, max_iter=100, eps=1e-6,
                block_n=None):
    """Pallas equivalent of DKM.forward(X, C_init) -> (C, a)."""
    N, D = X.shape
    K = C_init.shape[0]
    X = X.astype(jnp.float32)
    C_init = C_init.astype(jnp.float32)

    if block_n is None:
        # ~1 MiB f32 X tile (double-buffered by the pipeline => ~2 MiB VMEM
        # for X), conservative for v7x's smaller 64 MiB VMEM as well.
        block_n = max(128, min(1024, (1 << 20) // (4 * D) // 128 * 128))
        block_n = min(block_n, 128 * pl.cdiv(N, 128))
    n_pad = block_n * pl.cdiv(N, block_n)

    Xp = X if n_pad == N else jnp.pad(X, ((0, n_pad - N), (0, 0)))
    # ||x||^2 is loop-invariant: hoisted out of the per-iteration kernel.
    x2t = jnp.sum(Xp * Xp, axis=1)[None, :]                          # (1, n_pad)

    update, assign = _make_kernels(n_pad, N, D, K, block_n, temp, eps)

    # First iteration (mirrors the statements before the torch while-loop).
    C_new0, d0 = update(x2t, Xp, C_init)
    diff0 = d0[0, 0]

    def cond(state):
        _, _, diff, i = state
        return jnp.logical_and(diff > threshold, i < max_iter)

    def body(state):
        _, C_new, _, i = state
        C = C_new
        C_new, d = update(x2t, Xp, C)
        return (C, C_new, d[0, 0], i + 1)

    C, _, _, _ = lax.while_loop(
        cond, body, (C_init, C_new0, diff0, jnp.int32(0)))

    # PyTorch returns (self.C, self.a): the centroids used for the last
    # assignment, and those assignments.  `a` is computed exactly once, after
    # convergence, in lane-dense (K, N) layout, then handed back as (N, K).
    at = assign(x2t, Xp, C)
    a = at[:, :N].T
    return C, a


def _dkm_reference(X, C_init, temp=0.5, threshold=1e-4, max_iter=100, eps=1e-6):
    """Pure-jnp reference (same iteration-count semantics) for sanity checks."""
    X = jnp.asarray(X, jnp.float32)
    C_init = jnp.asarray(C_init, jnp.float32)

    def one_iter(C):
        d = -jnp.sqrt(jnp.maximum(
            jnp.sum(X * X, 1, keepdims=True)
            + jnp.sum(C * C, 1, keepdims=True).T
            - 2.0 * X @ C.T, 0.0))
        a = jax.nn.softmax(d / temp, axis=1)
        a_sum = jnp.sum(a, axis=0) + eps
        C_new = (a.T @ X) / a_sum[:, None]
        return a, C_new

    a, C_new = one_iter(C_init)
    C = C_init
    diff = jnp.sum(jnp.abs(C_new - C))
    i = 0
    while float(diff) > threshold and i < max_iter:
        C = C_new
        a, C_new = one_iter(C)
        diff = jnp.sum(jnp.abs(C_new - C))
        i += 1
    return C, a


if __name__ == "__main__":
    key = jax.random.PRNGKey(0)
    k1, k2, k3, k4, k5 = jax.random.split(key, 5)

    # --- case 1: small shapes (single N tile, padded/masked path) ------------
    N, D, K = 64, 32, 8
    X = jax.random.normal(k1, (N, D), dtype=jnp.float32)
    C_init = X[:K] + 0.01 * jax.random.normal(k2, (K, D), dtype=jnp.float32)

    C_out, a_out = jax.jit(dkm_forward)(X, C_init)
    jax.block_until_ready((C_out, a_out))

    C_ref, a_ref = _dkm_reference(X, C_init)
    assert C_out.shape == (K, D) and a_out.shape == (N, K)
    assert jnp.allclose(C_out, C_ref, atol=5e-3, rtol=5e-3)
    assert jnp.allclose(a_out, a_ref, atol=5e-3, rtol=5e-3)

    # --- case 2: larger clustered data, multiple N tiles (accumulator path) --
    N2, D2, K2 = 1000, 64, 16
    centers = 3.0 * jax.random.normal(k3, (K2, D2), dtype=jnp.float32)
    labels = jax.random.randint(k4, (N2,), 0, K2)
    X2 = centers[labels] + 0.1 * jax.random.normal(k5, (N2, D2),
                                                   dtype=jnp.float32)
    C2_init = X2[:K2]

    tiled_fn = jax.jit(functools.partial(dkm_forward, block_n=256))
    C2_out, a2_out = tiled_fn(X2, C2_init)
    jax.block_until_ready((C2_out, a2_out))

    C2_ref, a2_ref = _dkm_reference(X2, C2_init)
    assert C2_out.shape == (K2, D2) and a2_out.shape == (N2, K2)
    assert jnp.allclose(C2_out, C2_ref, atol=5e-3, rtol=5e-3)
    assert jnp.allclose(a2_out, a2_ref, atol=5e-3, rtol=5e-3)

    print("KERNEL_OK")
</pallas_src>

<mosaic_0001>
module attributes {stable_mosaic.version = 11 : i64} {
  func.func @_dkm_update_kernel(%arg0: i32, %arg1: memref<1x128xf32, #tpu.memory_space<vmem>>, %arg2: memref<128x32xf32, #tpu.memory_space<vmem>>, %arg3: memref<8x32xf32, #tpu.memory_space<vmem>>, %arg4: memref<8x32xf32, #tpu.memory_space<vmem>>, %arg5: memref<1x1xf32, #tpu.memory_space<vmem>>, %arg6: memref<8x32xf32, #tpu.memory_space<vmem>>, %arg7: memref<8x1xf32, #tpu.memory_space<vmem>>) attributes {dimension_semantics = [#tpu.dimension_semantics<arbitrary>], iteration_bounds = array<i64: 1>, scalar_prefetch = 0 : i64, scratch_operands = 2 : i64, tpu.core_type = #tpu.core_type<tc>, window_params = [{transform_indices = @transform_0, window_bounds = array<i64: 1, 128>}, {transform_indices = @transform_1, window_bounds = array<i64: 128, 32>}, {pipeline_mode = #tpu.pipeline_mode<synchronous>, transform_indices = @transform_2, window_bounds = array<i64: 8, 32>}, {pipeline_mode = #tpu.pipeline_mode<synchronous>, transform_indices = @transform_3, window_bounds = array<i64: 8, 32>}, {pipeline_mode = #tpu.pipeline_mode<synchronous>, transform_indices = @transform_4, window_bounds = array<i64: 1, 1>}]} {
    %c0_i32 = arith.constant 0 : i32
    %0 = arith.cmpi eq, %arg0, %c0_i32 : i32
    %1 = arith.extui %0 : i1 to i32
    %c0_i32_0 = arith.constant 0 : i32
    %2 = arith.cmpi ne, %1, %c0_i32_0 : i32
    scf.if %2 {
      %cst_26 = arith.constant 0.000000e+00 : f32
      %53 = vector.broadcast %cst_26 : f32 to vector<8x32xf32>
      %c0_27 = arith.constant 0 : index
      %c0_28 = arith.constant 0 : index
      %54 = vector.load %arg6[%c0_27, %c0_28] : memref<8x32xf32, #tpu.memory_space<vmem>>, vector<8x32xf32>
      tpu.vector_store %arg6[%c0_27, %c0_28], %53 {strides = array<i32>} : memref<8x32xf32, #tpu.memory_space<vmem>>, vector<8x32xf32>,
      %cst_29 = arith.constant 0.000000e+00 : f32
      %55 = vector.broadcast %cst_29 : f32 to vector<8x1xf32>
      %c0_30 = arith.constant 0 : index
      %c0_31 = arith.constant 0 : index
      %56 = vector.load %arg7[%c0_30, %c0_31] : memref<8x1xf32, #tpu.memory_space<vmem>>, vector<8x1xf32>
      tpu.vector_store %arg7[%c0_30, %c0_31], %55 {strides = array<i32>} : memref<8x1xf32, #tpu.memory_space<vmem>>, vector<8x1xf32>,
    } else {
    }
    %c0 = arith.constant 0 : index
    %c0_1 = arith.constant 0 : index
    %3 = vector.load %arg2[%c0, %c0_1] : memref<128x32xf32, #tpu.memory_space<vmem>>, vector<128x32xf32>
    %c0_2 = arith.constant 0 : index
    %c0_3 = arith.constant 0 : index
    %4 = vector.load %arg3[%c0_2, %c0_3] : memref<8x32xf32, #tpu.memory_space<vmem>>, vector<8x32xf32>
    %c0_4 = arith.constant 0 : index
    %c0_5 = arith.constant 0 : index
    %5 = vector.load %arg1[%c0_4, %c0_5] : memref<1x128xf32, #tpu.memory_space<vmem>>, vector<1x128xf32>
    %6 = arith.mulf %4, %4 : vector<8x32xf32>
    %cst = arith.constant dense<0.000000e+00> : vector<8xf32>
    %7 = vector.multi_reduction <add>, %6, %cst [1] : vector<8x32xf32> to vector<8xf32>
    %8 = vector.shape_cast %7 : vector<8xf32> to vector<8x1xf32>
    %cst_6 = arith.constant dense<0.000000e+00> : vector<8x128xf32>
    %9 = tpu.matmul %4, %3, %cst_6 {dimension_numbers = #tpu.dot_dimension_numbers<[1], [1], [0], [0], [0, 0, 1, 0], [], []>} : vector<8x32xf32>, vector<128x32xf32>, vector<8x128xf32> -> vector<8x128xf32>
    %10 = vector.broadcast %8 : vector<8x1xf32> to vector<8x128xf32>
    %11 = vector.broadcast %5 : vector<1x128xf32> to vector<8x128xf32>
    %12 = arith.addf %10, %11 : vector<8x128xf32>
    %cst_7 = arith.constant 2.000000e+00 : f32
    %13 = vector.broadcast %cst_7 : f32 to vector<8x128xf32>
    %14 = arith.mulf %13, %9 : vector<8x128xf32>
    %15 = arith.subf %12, %14 : vector<8x128xf32>
    %cst_8 = arith.constant 0.000000e+00 : f32
    %16 = vector.broadcast %cst_8 : f32 to vector<8x128xf32>
    %17 = arith.maximumf %15, %16 : vector<8x128xf32>
    %18 = math.sqrt %17 : vector<8x128xf32>
    %cst_9 = arith.constant 0.000000e+00 : f32
    %19 = vector.broadcast %cst_9 : f32 to vector<8x128xf32>
    %20 = arith.subf %19, %18 : vector<8x128xf32>
    %cst_10 = arith.constant 2.000000e+00 : f32
    %21 = vector.broadcast %cst_10 : f32 to vector<8x128xf32>
    %22 = arith.mulf %20, %21 : vector<8x128xf32>
    %cst_11 = arith.constant dense<0xFF800000> : vector<128xf32>
    %23 = vector.multi_reduction <maximumf>, %22, %cst_11 [0] : vector<8x128xf32> to vector<128xf32>
    %24 = vector.shape_cast %23 : vector<128xf32> to vector<1x128xf32>
    %25 = vector.broadcast %24 : vector<1x128xf32> to vector<8x128xf32>
    %26 = arith.subf %22, %25 : vector<8x128xf32>
    %27 = math.exp %26 : vector<8x128xf32>
    %cst_12 = arith.constant dense<0.000000e+00> : vector<128xf32>
    %28 = vector.multi_reduction <add>, %27, %cst_12 [0] : vector<8x128xf32> to vector<128xf32>
    %29 = vector.shape_cast %28 : vector<128xf32> to vector<1x128xf32>
    %30 = tpu.reciprocal %29 {approx = true} : vector<1x128xf32> -> vector<1x128xf32>
    %31 = vector.broadcast %30 : vector<1x128xf32> to vector<8x128xf32>
    %32 = arith.mulf %27, %31 : vector<8x128xf32>
    %c128_i32 = arith.constant 128 : i32
    %33 = arith.muli %arg0, %c128_i32 : i32
    %34 = tpu.iota {dimensions = array<i32: 1>} : vector<8x128xi32>
    %35 = vector.broadcast %33 : i32 to vector<8x128xi32>
    %36 = arith.addi %35, %34 : vector<8x128xi32>
    %c64_i32 = arith.constant 64 : i32
    %37 = vector.broadcast %c64_i32 : i32 to vector<8x128xi32>
    %38 = arith.cmpi slt, %36, %37 : vector<8x128xi32>
    %cst_13 = arith.constant 0.000000e+00 : f32
    %39 = vector.broadcast %cst_13 : f32 to vector<8x128xf32>
    %40 = arith.select %38, %32, %39 : vector<8x128xi1>, vector<8x128xf32>
    %c0_14 = arith.constant 0 : index
    %c0_15 = arith.constant 0 : index
    %41 = vector.load %arg7[%c0_14, %c0_15] : memref<8x1xf32, #tpu.memory_space<vmem>>, vector<8x1xf32>
    %cst_16 = arith.constant dense<0.000000e+00> : vector<8xf32>
    %42 = vector.multi_reduction <add>, %40, %cst_16 [1] : vector<8x128xf32> to vector<8xf32>
    %43 = vector.shape_cast %42 : vector<8xf32> to vector<8x1xf32>
    %44 = arith.addf %41, %43 : vector<8x1xf32>
    %c0_17 = arith.constant 0 : index
    %c0_18 = arith.constant 0 : index
    %45 = vector.load %arg7[%c0_17, %c0_18] : memref<8x1xf32, #tpu.memory_space<vmem>>, vector<8x1xf32>
    tpu.vector_store %arg7[%c0_17, %c0_18], %44 {strides = array<i32>} : memref<8x1xf32, #tpu.memory_space<vmem>>, vector<8x1xf32>,
    %c0_19 = arith.constant 0 : index
    %c0_20 = arith.constant 0 : index
    %46 = vector.load %arg6[%c0_19, %c0_20] : memref<8x32xf32, #tpu.memory_space<vmem>>, vector<8x32xf32>
    %cst_21 = arith.constant dense<0.000000e+00> : vector<8x32xf32>
    %47 = tpu.matmul %40, %3, %cst_21 {dimension_numbers = #tpu.dot_dimension_numbers<[1], [0], [0], [1], [0, 0, 1, 1], [], []>} : vector<8x128xf32>, vector<128x32xf32>, vector<8x32xf32> -> vector<8x32xf32>
    %48 = arith.addf %46, %47 : vector<8x32xf32>
    %c0_22 = arith.constant 0 : index
    %c0_23 = arith.constant 0 : index
    %49 = vector.load %arg6[%c0_22, %c0_23] : memref<8x32xf32, #tpu.memory_space<vmem>>, vector<8x32xf32>
    tpu.vector_store %arg6[%c0_22, %c0_23], %48 {strides = array<i32>} : memref<8x32xf32, #tpu.memory_space<vmem>>, vector<8x32xf32>,
    %c0_i32_24 = arith.constant 0 : i32
    %50 = arith.cmpi eq, %arg0, %c0_i32_24 : i32
    %51 = arith.extui %50 : i1 to i32
    %c0_i32_25 = arith.constant 0 : i32
    %52 = arith.cmpi ne, %51, %c0_i32_25 : i32
    scf.if %52 {
      %c0_26 = arith.constant 0 : index
      %c0_27 = arith.constant 0 : index
      %53 = vector.load %arg6[%c0_26, %c0_27] : memref<8x32xf32, #tpu.memory_space<vmem>>, vector<8x32xf32>
      %c0_28 = arith.constant 0 : index
      %c0_29 = arith.constant 0 : index
      %54 = vector.load %arg7[%c0_28, %c0_29] : memref<8x1xf32, #tpu.memory_space<vmem>>, vector<8x1xf32>
      %cst_30 = arith.constant 9.99999997E-7 : f32
      %55 = vector.broadcast %cst_30 : f32 to vector<8x1xf32>
      %56 = arith.addf %54, %55 : vector<8x1xf32>
      %57 = tpu.reciprocal %56 {approx = true} : vector<8x1xf32> -> vector<8x1xf32>
      %58 = vector.broadcast %57 : vector<8x1xf32> to vector<8x32xf32>
      %59 = arith.mulf %53, %58 : vector<8x32xf32>
      %c0_31 = arith.constant 0 : index
      %c0_32 = arith.constant 0 : index
      %60 = vector.load %arg4[%c0_31, %c0_32] : memref<8x32xf32, #tpu.memory_space<vmem>>, vector<8x32xf32>
      tpu.vector_store %arg4[%c0_31, %c0_32], %59 {strides = array<i32>} : memref<8x32xf32, #tpu.memory_space<vmem>>, vector<8x32xf32>,
      %61 = arith.subf %59, %4 : vector<8x32xf32>
      %62 = math.absf %61 : vector<8x32xf32>
      %cst_33 = arith.constant dense<0.000000e+00> : vector<8xf32>
      %63 = vector.multi_reduction <add>, %62, %cst_33 [1] : vector<8x32xf32> to vector<8xf32>
      %64 = vector.shape_cast %63 : vector<8xf32> to vector<8x1xf32>
      %cst_34 = arith.constant dense<0.000000e+00> : vector<1xf32>
      %65 = vector.multi_reduction <add>, %64, %cst_34 [0] : vector<8x1xf32> to vector<1xf32>
      %66 = vector.shape_cast %65 : vector<1xf32> to vector<1x1xf32>
      %c0_35 = arith.constant 0 : index
      %c0_36 = arith.constant 0 : index
      %67 = vector.load %arg5[%c0_35, %c0_36] : memref<1x1xf32, #tpu.memory_space<vmem>>, vector<1x1xf32>
      tpu.vector_store %arg5[%c0_35, %c0_36], %66 {strides = array<i32>} : memref<1x1xf32, #tpu.memory_space<vmem>>, vector<1x1xf32>,
    } else {
    }
    return
  }
  func.func @transform_0(%arg0: i32) -> (i32, i32) {
    %c0_i32 = arith.constant 0 : i32
    %c0_i32_0 = arith.constant 0 : i32
    return %c0_i32, %arg0 : i32, i32
  }
  func.func @transform_1(%arg0: i32) -> (i32, i32) {
    %c0_i32 = arith.constant 0 : i32
    %c0_i32_0 = arith.constant 0 : i32
    return %arg0, %c0_i32 : i32, i32
  }
  func.func @transform_2(%arg0: i32) -> (i32, i32) {
    %c0_i32 = arith.constant 0 : i32
    %c0_i32_0 = arith.constant 0 : i32
    %c0_i32_1 = arith.constant 0 : i32
    return %c0_i32, %c0_i32_0 : i32, i32
  }
  func.func @transform_3(%arg0: i32) -> (i32, i32) {
    %c0_i32 = arith.constant 0 : i32
    %c0_i32_0 = arith.constant 0 : i32
    %c0_i32_1 = arith.constant 0 : i32
    return %c0_i32, %c0_i32_0 : i32, i32
  }
  func.func @transform_4(%arg0: i32) -> (i32, i32) {
    %c0_i32 = arith.constant 0 : i32
    %c0_i32_0 = arith.constant 0 : i32
    %c0_i32_1 = arith.constant 0 : i32
    return %c0_i32, %c0_i32_0 : i32, i32
  }
}

module attributes {stable_mosaic.version = 11 : i64} {
  func.func @_dkm_assign_kernel(%arg0: i32, %arg1: memref<1x128xf32, #tpu.memory_space<vmem>>, %arg2: memref<128x32xf32, #tpu.memory_space<vmem>>, %arg3: memref<8x32xf32, #tpu.memory_space<vmem>>, %arg4: memref<8x128xf32, #tpu.memory_space<vmem>>) attributes {dimension_semantics = [#tpu.dimension_semantics<parallel>], iteration_bounds = array<i64: 1>, scalar_prefetch = 0 : i64, scratch_operands = 0 : i64, tpu.core_type = #tpu.core_type<tc>, window_params = [{transform_indices = @transform_0, window_bounds = array<i64: 1, 128>}, {transform_indices = @transform_1, window_bounds = array<i64: 128, 32>}, {pipeline_mode = #tpu.pipeline_mode<synchronous>, transform_indices = @transform_2, window_bounds = array<i64: 8, 32>}, {transform_indices = @transform_3, window_bounds = array<i64: 8, 128>}]} {
    %c0 = arith.constant 0 : index
    %c0_0 = arith.constant 0 : index
    %0 = vector.load %arg2[%c0, %c0_0] : memref<128x32xf32, #tpu.memory_space<vmem>>, vector<128x32xf32>
    %c0_1 = arith.constant 0 : index
    %c0_2 = arith.constant 0 : index
    %1 = vector.load %arg1[%c0_1, %c0_2] : memref<1x128xf32, #tpu.memory_space<vmem>>, vector<1x128xf32>
    %c0_3 = arith.constant 0 : index
    %c0_4 = arith.constant 0 : index
    %2 = vector.load %arg3[%c0_3, %c0_4] : memref<8x32xf32, #tpu.memory_space<vmem>>, vector<8x32xf32>
    %3 = arith.mulf %2, %2 : vector<8x32xf32>
    %cst = arith.constant dense<0.000000e+00> : vector<8xf32>
    %4 = vector.multi_reduction <add>, %3, %cst [1] : vector<8x32xf32> to vector<8xf32>
    %5 = vector.shape_cast %4 : vector<8xf32> to vector<8x1xf32>
    %cst_5 = arith.constant dense<0.000000e+00> : vector<8x128xf32>
    %6 = tpu.matmul %2, %0, %cst_5 {dimension_numbers = #tpu.dot_dimension_numbers<[1], [1], [0], [0], [0, 0, 1, 0], [], []>} : vector<8x32xf32>, vector<128x32xf32>, vector<8x128xf32> -> vector<8x128xf32>
    %7 = vector.broadcast %5 : vector<8x1xf32> to vector<8x128xf32>
    %8 = vector.broadcast %1 : vector<1x128xf32> to vector<8x128xf32>
    %9 = arith.addf %7, %8 : vector<8x128xf32>
    %cst_6 = arith.constant 2.000000e+00 : f32
    %10 = vector.broadcast %cst_6 : f32 to vector<8x128xf32>
    %11 = arith.mulf %10, %6 : vector<8x128xf32>
    %12 = arith.subf %9, %11 : vector<8x128xf32>
    %cst_7 = arith.constant 0.000000e+00 : f32
    %13 = vector.broadcast %cst_7 : f32 to vector<8x128xf32>
    %14 = arith.maximumf %12, %13 : vector<8x128xf32>
    %15 = math.sqrt %14 : vector<8x128xf32>
    %cst_8 = arith.constant 0.000000e+00 : f32
    %16 = vector.broadcast %cst_8 : f32 to vector<8x128xf32>
    %17 = arith.subf %16, %15 : vector<8x128xf32>
    %cst_9 = arith.constant 2.000000e+00 : f32
    %18 = vector.broadcast %cst_9 : f32 to vector<8x128xf32>
    %19 = arith.mulf %17, %18 : vector<8x128xf32>
    %cst_10 = arith.constant dense<0xFF800000> : vector<128xf32>
    %20 = vector.multi_reduction <maximumf>, %19, %cst_10 [0] : vector<8x128xf32> to vector<128xf32>
    %21 = vector.shape_cast %20 : vector<128xf32> to vector<1x128xf32>
    %22 = vector.broadcast %21 : vector<1x128xf32> to vector<8x128xf32>
    %23 = arith.subf %19, %22 : vector<8x128xf32>
    %24 = math.exp %23 : vector<8x128xf32>
    %cst_11 = arith.constant dense<0.000000e+00> : vector<128xf32>
    %25 = vector.multi_reduction <add>, %24, %cst_11 [0] : vector<8x128xf32> to vector<128xf32>
    %26 = vector.shape_cast %25 : vector<128xf32> to vector<1x128xf32>
    %27 = tpu.reciprocal %26 {approx = true} : vector<1x128xf32> -> vector<1x128xf32>
    %28 = vector.broadcast %27 : vector<1x128xf32> to vector<8x128xf32>
    %29 = arith.mulf %24, %28 : vector<8x128xf32>
    %c0_12 = arith.constant 0 : index
    %c0_13 = arith.constant 0 : index
    %30 = vector.load %arg4[%c0_12, %c0_13] : memref<8x128xf32, #tpu.memory_space<vmem>>, vector<8x128xf32>
    tpu.vector_store %arg4[%c0_12, %c0_13], %29 {strides = array<i32>} : memref<8x128xf32, #tpu.memory_space<vmem>>, vector<8x128xf32>,
    return
  }
  func.func @transform_0(%arg0: i32) -> (i32, i32) {
    %c0_i32 = arith.constant 0 : i32
    %c0_i32_0 = arith.constant 0 : i32
    return %c0_i32, %arg0 : i32, i32
  }
  func.func @transform_1(%arg0: i32) -> (i32, i32) {
    %c0_i32 = arith.constant 0 : i32
    %c0_i32_0 = arith.constant 0 : i32
    return %arg0, %c0_i32 : i32, i32
  }
  func.func @transform_2(%arg0: i32) -> (i32, i32) {
    %c0_i32 = arith.constant 0 : i32
    %c0_i32_0 = arith.constant 0 : i32
    %c0_i32_1 = arith.constant 0 : i32
    return %c0_i32, %c0_i32_0 : i32, i32
  }
  func.func @transform_3(%arg0: i32) -> (i32, i32) {
    %c0_i32 = arith.constant 0 : i32
    %c0_i32_0 = arith.constant 0 : i32
    return %c0_i32, %arg0 : i32, i32
  }
}

</mosaic_0001>

<bundles_post_ra>
// kernel: dkm_forward.3
= control target key start
LH: loop header
LB: loop body
LE: loop exit
PB: predicated region body
PF: predicated region fallthrough
CT: control target
= control target key end

     0   :  { %8 = vsyncpa [#allocation3], 0  ;;  %s313_s12 = smov [#allocation2]   ;;  %s411_s0 = inlined_call_operand.vmem [shape: f32[1,128], index: 0, kind: input, shape index: {}]   ;;  %s412_s1 = inlined_call_operand.vmem [shape: f32[128,32], index: 1, kind: input, shape index: {}]   ;;  %s413_s2 = inlined_call_operand.hbm [shape: f32[8,32], index: 2, kind: input, shape index: {}]   ;;  %s414_s3 = inlined_call_operand.vmem [shape: f32[8,128], index: 3, kind: output, shape index: {}]  }
   0x1   :  { %s19_s13 = sshll.u32 %s313_s12, 4  ;;  %s20_s13 = int_to_ptr.vmem [resolvable:$true] %s19_s13 }
   0x2   :  { %s299_s14 = scalar_lea.vmem %s20_s13, 128  ;;  %p304_p1 = scmp.lt.s32.totalorder %s20_s13, %s20_s13 }
   0x3   :  { %p300_p0 = scmp.ne.s32.totalorder %s20_s13, %s299_s14  ;;  %p305_p2 = scmp.lt.s32.totalorder %s299_s14, %s299_s14 }
   0x5   :  { %p306_p3 = por %p305_p2, %p304_p1 }
   0x7   :  { %p307_p4 = pnand %p306_p3, %p300_p0 }
   0x9   :  { %310 = shalt.err (!%p307_p4)
}
   0xa   :  { %22 = dma.hbm_to_vmem [thread:$0]  %s413_s2, 128, %s20_s13, [#allocation3]  }
   0xb   :  { %311 = dma.done.wait [#allocation3], 128  }
   0xc   :  { %312 = vsyncadd [#allocation3], 4294967168  ;;  %v314_v0 = vmov 0.0   ;;  %vm315_vm0 = vmmov 0   ;;  %vm45_vm1 = vcmask 261120   ;;  %v41_v1 = vld [vmem:[%s412_s1 + $0x78] sm:$0xff] }
   0xd   :  { %247 = vmatprep.subr.mxu0 %v314_v0  ;;  %279 = vmatprep.mubr.msk.f32.mxu0 %vm315_vm0, %v314_v0  ;;  %v40_v2 = vld [vmem:[%s412_s1 + $0x70] sm:$0xff]  ;;  %v43_v3 = vld [vmem:[#allocation2] sm:$0xff]  ;;  %v39_v4 = vld [vmem:[%s412_s1 + $0x68] sm:$0xff] }
   0xe   :  { %248 = vmatpush3.xpose.msk.msra.mxu0 %vm45_vm1, %v41_v1  ;;  %v44_v5 = vmul.f32 %v43_v3, %v43_v3  ;;  %v38_v7 = vld [vmem:[%s412_s1 + $0x60] sm:$0xff]  ;;  %v37_v8 = vld [vmem:[%s412_s1 + $0x58] sm:$0xff]  ;;  %v36_v9 = vld [vmem:[%s412_s1 + $0x50] sm:$0xff] }
   0xf   :  { %249 = vmatprep.subr.mxu0 %v314_v0  ;;  %v35_v10 = vld [vmem:[%s412_s1 + $0x48] sm:$0xff]  ;;  %v34_v11 = vld [vmem:[%s412_s1 + $0x40] sm:$0xff]  ;;  %v33_v12 = vld [vmem:[%s412_s1 + $0x38] sm:$0xff] }
  0x10   :  { %v46_v6 = vsel %vm45_vm1, %v44_v5, 0.0  ;;  %v32_v13 = vld [vmem:[%s412_s1 + $0x30] sm:$0xff]  ;;  %v31_v14 = vld [vmem:[%s412_s1 + $0x28] sm:$0xff]  ;;  %v30_v15 = vld [vmem:[%s412_s1 + $0x20] sm:$0xff] }
  0x11   :  { %47 = vadd.xlane.f32.xlu0 %v46_v6  ;;  %v29_v16 = vld [vmem:[%s412_s1 + $0x18] sm:$0xff]  ;;  %v28_v17 = vld [vmem:[%s412_s1 + $0x10] sm:$0xff]  ;;  %v27_v18 = vld [vmem:[%s412_s1 + $0x8] sm:$0xff] }
  0x12   :  { %250 = vmatpush3.xpose.msk.msra.mxu0 %vm45_vm1, %v40_v2  ;;  %v26_v19 = vld [vmem:[%s412_s1] sm:$0xff] }
  0x13   :  { %251 = vmatprep.subr.mxu0 %v314_v0  ;;  %v229_v20 = vld [vmem:[%s411_s0] ss:$0 sm:$0xff] }
  0x16   :  { %252 = vmatpush3.xpose.msk.msra.mxu0 %vm45_vm1, %v39_v4 }
  0x17   :  { %253 = vmatprep.subr.mxu0 %v314_v0 }
  0x1a   :  { %254 = vmatpush3.xpose.msk.msra.mxu0 %vm45_vm1, %v38_v7 }
  0x1b   :  { %255 = vmatprep.subr.mxu0 %v314_v0 }
  0x1e   :  { %256 = vmatpush3.xpose.msk.msra.mxu0 %vm45_vm1, %v37_v8 }
  0x1f   :  { %257 = vmatprep.subr.mxu0 %v314_v0 }
  0x22   :  { %258 = vmatpush3.xpose.msk.msra.mxu0 %vm45_vm1, %v36_v9 }
  0x23   :  { %259 = vmatprep.subr.mxu0 %v314_v0 }
  0x26   :  { %260 = vmatpush3.xpose.msk.msra.mxu0 %vm45_vm1, %v35_v10 }
  0x27   :  { %261 = vmatprep.subr.mxu0 %v314_v0 }
  0x2a   :  { %262 = vmatpush3.xpose.msk.msra.mxu0 %vm45_vm1, %v34_v11 }
  0x2b   :  { %263 = vmatprep.subr.mxu0 %v314_v0 }
  0x2e   :  { %264 = vmatpush3.xpose.msk.msra.mxu0 %vm45_vm1, %v33_v12 }
  0x2f   :  { %265 = vmatprep.subr.mxu0 %v314_v0 }
  0x32   :  { %266 = vmatpush3.xpose.msk.msra.mxu0 %vm45_vm1, %v32_v13 }
  0x33   :  { %267 = vmatprep.subr.mxu0 %v314_v0 }
  0x36   :  { %268 = vmatpush3.xpose.msk.msra.mxu0 %vm45_vm1, %v31_v14 }
  0x37   :  { %269 = vmatprep.subr.mxu0 %v314_v0 }
  0x3a   :  { %270 = vmatpush3.xpose.msk.msra.mxu0 %vm45_vm1, %v30_v15 }
  0x3b   :  { %271 = vmatprep.subr.mxu0 %v314_v0 }
  0x3e   :  { %272 = vmatpush3.xpose.msk.msra.mxu0 %vm45_vm1, %v29_v16 }
  0x3f   :  { %273 = vmatprep.subr.mxu0 %v314_v0 }
  0x42   :  { %274 = vmatpush3.xpose.msk.msra.mxu0 %vm45_vm1, %v28_v17 }
  0x43   :  { %275 = vmatprep.subr.mxu0 %v314_v0 }
  0x46   :  { %276 = vmatpush3.xpose.msk.msra.mxu0 %vm45_vm1, %v27_v18 }
  0x47   :  { %277 = vmatprep.subr.mxu0 %v314_v0 }
  0x4a   :  { %278 = vmatpush3.xpose.msk.msra.mxu0 %vm45_vm1, %v26_v19 }
  0x4d   :  { %280 = vmatmul.mubr.msk.f32.vlgmr.msra.gmra.mxu0 %vm45_vm1, %v43_v3 }
  0x9a   :  { %v48_v21 = vpop.xlane.xlu0 %47 }
  0x9b   :  { %v176_v22 = vadd.f32 %v229_v20, %v48_v21 }
 0x10d   :  { %v166_v23 = vpop.f32.mrf.mxu0 }
 0x10e   :  { %v177_v24 = vmul.f32 2.0, %v166_v23 }
 0x10f   :  { %v281_v25 = vpop.f32.mrf.mxu0 }
 0x110   :  { %v178_v26 = vsub.f32 %v176_v22, %v177_v24 }
 0x112   :  { %v179_v27 = vmax.f32 %v178_v26, 0.0 }
 0x114   :  { %285 = vrsqrt.f32 %v179_v27  ;;  %vm182_vm2 = vcmp.eq.f32.partialorder %v179_v27, inf  ;;  %v185_v30 = vand.u32 2147483648, %v179_v27  ;;  %vm184_vm3 = vcmp.eq.f32.partialorder %v179_v27, 0.0 }
 0x121   :  { %v286_v28 = vpop.eup %285 }
 0x122   :  { %v181_v29 = vmul.f32 %v286_v28, %v179_v27 }
 0x124   :  { %v183_v31 = vsel %vm182_vm2, %v179_v27, %v181_v29 }
 0x125   :  { %v186_v32 = vsel %vm184_vm3, %v185_v30, %v183_v31 }
 0x126   :  { %v187_v33 = vsub.f32 0.0, %v186_v32 }
 0x128   :  { %v188_v34 = vmul.f32 2.0, %v187_v33 }
 0x12a   :  { %v189_v35 = vrot.slane %v188_v34, 4 }
 0x12c   :  { %v190_v36 = vmax.f32 %v188_v34, %v189_v35 }
 0x12e   :  { %v191_v37 = vrot.slane %v190_v36, 2 }
 0x130   :  { %v192_v38 = vmax.f32 %v190_v36, %v191_v37 }
 0x132   :  { %v193_v39 = vrot.slane %v192_v38, 1 }
 0x134   :  { %v194_v40 = vmax.f32 %v192_v38, %v193_v39 }
 0x136   :  { %v195_v41 = vsub.f32 %v188_v34, %v194_v40 }
 0x138   :  { %v196_v42 = vmul.f32 1.442695, %v195_v41 }
 0x13a   :  { %287 = vpow2.f32 %v196_v42 }
 0x147   :  { %v288_v43 = vpop.eup %287 }
 0x148   :  { %v198_v44 = vrot.slane %v288_v43, 4 }
 0x14a   :  { %v199_v45 = vadd.f32 %v288_v43, %v198_v44 }
 0x14c   :  { %v200_v46 = vrot.slane %v199_v45, 2 }
 0x14e   :  { %v201_v47 = vadd.f32 %v200_v46, %v199_v45 }
 0x150   :  { %v202_v48 = vrot.slane %v201_v47, 1 }
 0x152   :  { %v203_v49 = vadd.f32 %v202_v48, %v201_v47 }
 0x154   :  { %289 = vrcp.f32 %v203_v49 }
 0x161   :  { %v290_v50 = vpop.eup %289 }
 0x162   :  { %v205_v51 = vmul.f32 %v290_v50, %v288_v43 }
 0x164   :  { %206 = vst [vmem:[%s414_s3] sm:$0xff] %v205_v51 }
 0x165   :  { %211 = vsyncpa [#allocation3], 1 }

// kernel: dkm_forward.2
= control target key start
LH: loop header
LB: loop body
LE: loop exit
PB: predicated region body
PF: predicated region fallthrough
CT: control target
= control target key end

     0   :  { %vm21_vm0 = vcmask 261120   ;;  %v495_v1 = vmov 0.0   ;;  %vm496_vm1 = vmmov 0   ;;  %s650_s0 = inlined_call_operand.vmem [shape: f32[1,128], index: 0, kind: input, shape index: {}]   ;;  %s651_s1 = inlined_call_operand.vmem [shape: f32[128,32], index: 1, kind: input, shape index: {}]   ;;  %s652_s2 = inlined_call_operand.vmem [shape: f32[8,32], index: 2, kind: input, shape index: {}]   ;;  %s653_s3 = inlined_call_operand.vmem [shape: f32[8,32], index: 3, kind: output, shape index: {0}]   ;;  %s654_s4 = inlined_call_operand.hbm [shape: f32[1,1], index: 4, kind: output, shape index: {1}]  }
   0x1   :  { %v40_v0 = vld [vmem:[%s651_s1 + $0x78] sm:$0xff]  ;;  %389 = vmatprep.subr.mxu0 %v495_v1  ;;  %22 = vst.msk [vmem:[#allocation2] sm:$0xff] %vm21_vm0, %v495_v1  ;;  %421 = vmatprep.mubr.msk.f32.mxu0 %vm496_vm1, %v495_v1  ;;  %v39_v2 = vld [vmem:[%s651_s1 + $0x70] sm:$0xff]  ;;  %v542_v3 = vld [vmem:[%s652_s2] sm:$0xff] }
   0x2   :  { %390 = vmatpush3.xpose.msk.msra.mxu0 %vm21_vm0, %v40_v0  ;;  %424 = vmatprep.subr.mxu1 %v495_v1 }
   0x3   :  { %391 = vmatprep.subr.mxu0 %v495_v1  ;;  %425 = vmatpush3.msra.mxu1 %v40_v0 }
   0x4   :  { %426 = vmatprep.subr.mxu1 %v495_v1  ;;  %456 = vmatprep.mubr.msk.f32.mxu1 %vm496_vm1, %v495_v1 }
   0x5   :  { %427 = vmatpush3.msra.mxu1 %v39_v2 }
   0x6   :  { %10 = vsyncpa [#allocation5], 0  ;;  %392 = vmatpush3.xpose.msk.msra.mxu0 %vm21_vm0, %v39_v2  ;;  %v38_v4 = vld [vmem:[%s651_s1 + $0x68] sm:$0xff]  ;;  %v43_v5 = vmul.f32 %v542_v3, %v542_v3  ;;  %428 = vmatprep.subr.mxu1 %v495_v1  ;;  %v37_v6 = vld [vmem:[%s651_s1 + $0x60] sm:$0xff]  ;;  %vm23_vm2 = vcmask 7168   ;;  %v206_v50 = vlaneseq  ;;  %v497_v55 = vmov 0  }
   0x7   :  { %393 = vmatprep.subr.mxu0 %v495_v1  ;;  %429 = vmatpush3.msra.mxu1 %v38_v4  ;;  %v36_v8 = vld [vmem:[%s651_s1 + $0x58] sm:$0xff]  ;;  %v35_v9 = vld [vmem:[%s651_s1 + $0x50] sm:$0xff]  ;;  %v34_v10 = vld [vmem:[%s651_s1 + $0x48] sm:$0xff]  ;;  %24 = vst.msk [vmem:[#allocation3] sm:$0xff] %vm23_vm2, %v495_v1  ;;  %s498_s24 = smov [#allocation4]   ;;  %vm316_vm6 = vcmask 0  }
   0x8   :  { %v45_v7 = vsel %vm21_vm0, %v43_v5, 0.0  ;;  %430 = vmatprep.subr.mxu1 %v495_v1  ;;  %v33_v11 = vld [vmem:[%s651_s1 + $0x40] sm:$0xff]  ;;  %v32_v12 = vld [vmem:[%s651_s1 + $0x38] sm:$0xff]  ;;  %v31_v13 = vld [vmem:[%s651_s1 + $0x30] sm:$0xff]  ;;  %v207_v51 = vand.u32 127, %v206_v50  ;;  %463 = vset.pattern.permute.xlu1 %v497_v55  ;;  %s326_s2 = sshll.u32 %s498_s24, 4  ;;  %s327_s2 = int_to_ptr.vmem [resolvable:$true] %s326_s2 }
   0x9   :  { %46 = vadd.xlane.f32.xlu0 %v45_v7  ;;  %431 = vmatpush3.msra.mxu1 %v37_v6  ;;  %v30_v14 = vld [vmem:[%s651_s1 + $0x28] sm:$0xff]  ;;  %v29_v15 = vld [vmem:[%s651_s1 + $0x20] sm:$0xff]  ;;  %v28_v16 = vld [vmem:[%s651_s1 + $0x18] sm:$0xff]  ;;  %s473_s25 = scalar_lea.vmem %s327_s2, 16  ;;  %p478_p1 = scmp.lt.s32.totalorder %s327_s2, %s327_s2 }
   0xa   :  { %394 = vmatpush3.xpose.msk.msra.mxu0 %vm21_vm0, %v38_v4  ;;  %432 = vmatprep.subr.mxu1 %v495_v1  ;;  %v27_v17 = vld [vmem:[%s651_s1 + $0x10] sm:$0xff]  ;;  %v26_v18 = vld [vmem:[%s651_s1 + $0x8] sm:$0xff]  ;;  %v25_v19 = vld [vmem:[%s651_s1] sm:$0xff]  ;;  %vm210_vm5 = vcmp.lt.s32.totalorder %v207_v51, 64  ;;  %p474_p0 = scmp.ne.s32.totalorder %s327_s2, %s473_s25 }
   0xb   :  { %395 = vmatprep.subr.mxu0 %v495_v1  ;;  %433 = vmatpush3.msra.mxu1 %v36_v8  ;;  %v353_v20 = vld [vmem:[%s650_s0] ss:$0 sm:$0xff] }
   0xc   :  { %434 = vmatprep.subr.mxu1 %v495_v1  ;;  %464 = vset.pattern.permute.xlu0 %v497_v55  ;;  %v218_v62 = vld [vmem:[#allocation2] sm:$0xff] }
   0xd   :  { %435 = vmatpush3.msra.mxu1 %v35_v9 }
   0xe   :  { %396 = vmatpush3.xpose.msk.msra.mxu0 %vm21_vm0, %v37_v6  ;;  %436 = vmatprep.subr.mxu1 %v495_v1  ;;  %v212_v56 = vld [vmem:[#allocation3] sm:$0xff] }
   0xf   :  { %397 = vmatprep.subr.mxu0 %v495_v1  ;;  %437 = vmatpush3.msra.mxu1 %v34_v10 }
  0x10   :  { %438 = vmatprep.subr.mxu1 %v495_v1 }
  0x11   :  { %439 = vmatpush3.msra.mxu1 %v33_v11 }
  0x12   :  { %398 = vmatpush3.xpose.msk.msra.mxu0 %vm21_vm0, %v36_v8  ;;  %440 = vmatprep.subr.mxu1 %v495_v1 }
  0x13   :  { %399 = vmatprep.subr.mxu0 %v495_v1  ;;  %441 = vmatpush3.msra.mxu1 %v32_v12 }
  0x14   :  { %442 = vmatprep.subr.mxu1 %v495_v1 }
  0x15   :  { %443 = vmatpush3.msra.mxu1 %v31_v13 }
  0x16   :  { %400 = vmatpush3.xpose.msk.msra.mxu0 %vm21_vm0, %v35_v9  ;;  %444 = vmatprep.subr.mxu1 %v495_v1 }
  0x17   :  { %401 = vmatprep.subr.mxu0 %v495_v1  ;;  %445 = vmatpush3.msra.mxu1 %v30_v14 }
  0x18   :  { %446 = vmatprep.subr.mxu1 %v495_v1 }
  0x19   :  { %447 = vmatpush3.msra.mxu1 %v29_v15 }
  0x1a   :  { %402 = vmatpush3.xpose.msk.msra.mxu0 %vm21_vm0, %v34_v10  ;;  %448 = vmatprep.subr.mxu1 %v495_v1 }
  0x1b   :  { %403 = vmatprep.subr.mxu0 %v495_v1  ;;  %449 = vmatpush3.msra.mxu1 %v28_v16 }
  0x1c   :  { %450 = vmatprep.subr.mxu1 %v495_v1 }
  0x1d   :  { %451 = vmatpush3.msra.mxu1 %v27_v17 }
  0x1e   :  { %404 = vmatpush3.xpose.msk.msra.mxu0 %vm21_vm0, %v33_v11  ;;  %452 = vmatprep.subr.mxu1 %v495_v1 }
  0x1f   :  { %405 = vmatprep.subr.mxu0 %v495_v1  ;;  %453 = vmatpush3.msra.mxu1 %v26_v18 }
  0x20   :  { %454 = vmatprep.subr.mxu1 %v495_v1 }
  0x21   :  { %455 = vmatpush3.msra.mxu1 %v25_v19 }
  0x22   :  { %406 = vmatpush3.xpose.msk.msra.mxu0 %vm21_vm0, %v32_v12 }
  0x23   :  { %407 = vmatprep.subr.mxu0 %v495_v1 }
  0x26   :  { %408 = vmatpush3.xpose.msk.msra.mxu0 %vm21_vm0, %v31_v13 }
  0x27   :  { %409 = vmatprep.subr.mxu0 %v495_v1 }
  0x2a   :  { %410 = vmatpush3.xpose.msk.msra.mxu0 %vm21_vm0, %v30_v14 }
  0x2b   :  { %411 = vmatprep.subr.mxu0 %v495_v1 }
  0x2e   :  { %412 = vmatpush3.xpose.msk.msra.mxu0 %vm21_vm0, %v29_v15 }
  0x2f   :  { %413 = vmatprep.subr.mxu0 %v495_v1 }
  0x32   :  { %414 = vmatpush3.xpose.msk.msra.mxu0 %vm21_vm0, %v28_v16 }
  0x33   :  { %415 = vmatprep.subr.mxu0 %v495_v1 }
  0x36   :  { %416 = vmatpush3.xpose.msk.msra.mxu0 %vm21_vm0, %v27_v17 }
  0x37   :  { %417 = vmatprep.subr.mxu0 %v495_v1 }
  0x3a   :  { %418 = vmatpush3.xpose.msk.msra.mxu0 %vm21_vm0, %v26_v18 }
  0x3b   :  { %419 = vmatprep.subr.mxu0 %v495_v1 }
  0x3e   :  { %420 = vmatpush3.xpose.msk.msra.mxu0 %vm21_vm0, %v25_v19 }
  0x41   :  { %422 = vmatmul.mubr.msk.f32.vlgmr.msra.gmra.mxu0 %vm21_vm0, %v542_v3 }
  0x92   :  { %v47_v21 = vpop.xlane.xlu0 %46 }
  0x93   :  { %v175_v22 = vadd.f32 %v353_v20, %v47_v21 }
 0x101   :  { %v165_v23 = vpop.f32.mrf.mxu0 }
 0x102   :  { %v176_v24 = vmul.f32 2.0, %v165_v23 }
 0x103   :  { %v423_v25 = vpop.f32.mrf.mxu0 }
 0x104   :  { %v177_v26 = vsub.f32 %v175_v22, %v176_v24 }
 0x106   :  { %v178_v27 = vmax.f32 %v177_v26, 0.0 }
 0x108   :  { %465 = vrsqrt.f32 %v178_v27  ;;  %vm181_vm3 = vcmp.eq.f32.partialorder %v178_v27, inf  ;;  %v184_v30 = vand.u32 2147483648, %v178_v27  ;;  %vm183_vm4 = vcmp.eq.f32.partialorder %v178_v27, 0.0 }
 0x115   :  { %v466_v28 = vpop.eup %465 }
 0x116   :  { %v180_v29 = vmul.f32 %v466_v28, %v178_v27 }
 0x118   :  { %v182_v31 = vsel %vm181_vm3, %v178_v27, %v180_v29 }
 0x119   :  { %v185_v32 = vsel %vm183_vm4, %v184_v30, %v182_v31 }
 0x11a   :  { %v186_v33 = vsub.f32 0.0, %v185_v32 }
 0x11c   :  { %v187_v34 = vmul.f32 2.0, %v186_v33 }
 0x11e   :  { %v188_v35 = vrot.slane %v187_v34, 4 }
 0x120   :  { %v189_v36 = vmax.f32 %v187_v34, %v188_v35 }
 0x122   :  { %v190_v37 = vrot.slane %v189_v36, 2 }
 0x124   :  { %v191_v38 = vmax.f32 %v189_v36, %v190_v37 }
 0x126   :  { %v192_v39 = vrot.slane %v191_v38, 1 }
 0x128   :  { %v193_v40 = vmax.f32 %v191_v38, %v192_v39 }
 0x12a   :  { %v194_v41 = vsub.f32 %v187_v34, %v193_v40 }
 0x12c   :  { %v195_v42 = vmul.f32 1.442695, %v194_v41 }
 0x12e   :  { %467 = vpow2.f32 %v195_v42 }
 0x13b   :  { %v468_v43 = vpop.eup %467 }
 0x13c   :  { %v197_v44 = vrot.slane %v468_v43, 4 }
 0x13e   :  { %v198_v45 = vadd.f32 %v468_v43, %v197_v44 }
 0x140   :  { %v199_v46 = vrot.slane %v198_v45, 2 }
 0x142   :  { %v200_v47 = vadd.f32 %v199_v46, %v198_v45 }
 0x144   :  { %v201_v48 = vrot.slane %v200_v47, 1 }
 0x146   :  { %v202_v49 = vadd.f32 %v201_v48, %v200_v47 }
 0x148   :  { %469 = vrcp.f32 %v202_v49 }
 0x155   :  { %v470_v52 = vpop.eup %469 }
 0x156   :  { %v204_v53 = vmul.f32 %v470_v52, %v468_v43 }
 0x158   :  { %457 = vmatmul.mubr.msk.f32.vlgmr.msra.gmra.mxu1 %vm210_vm5, %v204_v53  ;;  %v211_v54 = vsel %vm210_vm5, %v204_v53, 0.0 }
 0x159   :  { %213 = vadd.xlane.f32.xlu0 %v211_v54 }
 0x1e2   :  { %v214_v57 = vpop.xlane.xlu0 %213 }
 0x1e3   :  { %v215_v58 = vadd.f32 %v214_v57, %v212_v56 }
 0x1e5   :  { %217 = vst.msk [vmem:[#allocation3] sm:$0xff] %vm23_vm2, %v215_v58 }
 0x1ec   :  { %v295_v59 = vld [vmem:[#allocation3] sm:$0xff] }
 0x1ed   :  { %v296_v60 = vadd.f32 1e-06, %v295_v59 }
 0x1ef   :  { %471 = vrcp.f32 %v296_v60 }
 0x1fc   :  { %v472_v61 = vpop.eup %471 }
 0x1fd   :  { %300 = vperm.xlu1 %463, %v472_v61  }
 0x218   :  { %v285_v63 = vpop.f32.mrf.mxu1 }
 0x219   :  { %v289_v0 = vadd.f32 %v285_v63, %v218_v62 }
 0x21a   :  { %v458_v1 = vpop.f32.mrf.mxu1 }
 0x21b   :  { %290 = vst.msk [vmem:[#allocation2] sm:$0xff] %vm21_vm0, %v289_v0 }
 0x222   :  { %v294_v4 = vld [vmem:[#allocation2] sm:$0xff] }
 0x278   :  { %v301_v2 = vpop.permute.xlu1 %300 }
 0x279   :  { %v303_v5 = vmul.f32 %v301_v2, %v294_v4 }
 0x27b   :  { %304 = vst.msk [vmem:[%s653_s3] sm:$0xff] %vm21_vm0, %v303_v5  ;;  %v305_v6 = vsub.f32 %v303_v5, %v542_v3  ;;  %s477_s3 = scalar_lea.vmem %s327_s2, 32 }
 0x27c   :  { %p479_p2 = scmp.lt.s32.totalorder %s477_s3, %s473_s25 }
 0x27d   :  { %v306_v7 = vand.u32 2147483647, %v305_v6 }
 0x27e   :  { %p480_p3 = por %p479_p2, %p478_p1 }
 0x27f   :  { %v307_v8 = vsel %vm21_vm0, %v306_v7, 0.0 }
 0x280   :  { %308 = vadd.xlane.f32.xlu1 %v307_v8  ;;  %p481_p4 = pnand %p480_p3, %p474_p0 }
 0x309   :  { %v309_v9 = vpop.xlane.xlu1 %308 }
 0x30a   :  { %v310_v10 = vrot.slane %v309_v9, 4 }
 0x30c   :  { %v311_v11 = vadd.f32 %v310_v10, %v309_v9 }
 0x30e   :  { %v312_v12 = vrot.slane %v311_v11, 2 }
 0x310   :  { %v313_v13 = vadd.f32 %v312_v12, %v311_v11 }
 0x312   :  { %v314_v14 = vrot.slane %v313_v13, 1 }
 0x314   :  { %v315_v15 = vadd.f32 %v314_v14, %v313_v13 }
 0x316   :  { %317 = vst.msk [vmem:[#allocation4] sm:$0x1] %vm316_vm6, %v315_v15 }
 0x317   :  { %484 = shalt.err (!%p481_p4)
}
 0x318   :  { %329 = dma.vmem_to_hbm [thread:$0]  %s327_s2, 16, %s654_s4, [#allocation5]  }
 0x319   :  { %493 = dma.done.wait [#allocation5], 16  }
 0x31a   :  { %494 = vsyncadd [#allocation5], 4294967280 }
 0x31b   :  { %335 = vsyncpa [#allocation5], 1 }

</bundles_post_ra>
